<compile_context>
chip_gen: v7x
topology: tpu7x:2x2x1
jax: 0.10.0
libtpu: 0.0.40
codegen_flags: <defaults>
</compile_context>

<pallas_src>
import jax
import jax.numpy as jnp
import numpy as np
from jax.experimental import pallas as pl
from jax.experimental.pallas import tpu as pltpu

N_HIDDEN_LAYERS = 4
HID = 20
SUB = 512           # compute sub-chunk width (lanes) — bounded vreg pressure


def make_pinn_kernel(subs_per_tile, sub):
    """Builds a kernel processing `subs_per_tile` sub-chunks of `sub` lanes."""

    def pinn_kernel(t_ref, w_in_ref, b_in_ref, w_h_ref, b_h_ref,
                    w_out_ref, b_out_ref, o_ref):
        # Hoist all weights once per grid step (tiny: ~7 KB total).
        w_in = w_in_ref[...]                                   # (HID, 1)
        b_in = b_in_ref[...]                                   # (HID, 1)
        w_hs = [w_h_ref[i] for i in range(N_HIDDEN_LAYERS)]    # (HID, HID) each
        b_hs = [b_h_ref[i] for i in range(N_HIDDEN_LAYERS)]    # (HID, 1) each
        w_out = w_out_ref[...]                                 # (HID, 1)
        b_out = b_out_ref[...]                                 # (1, 1)

        def chain(t_sub):
            # Input layer Linear(1, 20): K=1 matmul == outer product -> VPU.
            h = jnp.tanh(w_in * t_sub + b_in)                  # (HID, sub)
            # hidden_layers[0] is an extra nn.Tanh()
            h = jnp.tanh(h)
            # 4 x (Linear(20, 20) -> Tanh); MXU shape (20,20)@(20,sub).
            for i in range(N_HIDDEN_LAYERS):
                h = jnp.tanh(
                    jnp.dot(w_hs[i], h, preferred_element_type=jnp.float32)
                    + b_hs[i]
                )
            # Output layer Linear(20, 1): sublane (XLU) reduce, lane-dense out.
            return jnp.sum(w_out * h, axis=0, keepdims=True) + b_out

        # Emit sub-chunks in independent pairs: the two chains have no data
        # dependence, so the scheduler can overlap EUP (tanh) of one with the
        # MXU matmuls of the other.
        c = 0
        while c + 1 < subs_per_tile:
            t0 = t_ref[:, pl.ds(c * sub, sub)]
            t1 = t_ref[:, pl.ds((c + 1) * sub, sub)]
            o_ref[:, pl.ds(c * sub, sub)] = chain(t0)
            o_ref[:, pl.ds((c + 1) * sub, sub)] = chain(t1)
            c += 2
        if c < subs_per_tile:
            o_ref[:, pl.ds(c * sub, sub)] = chain(t_ref[:, pl.ds(c * sub, sub)])

    return pinn_kernel


def pinn_forward(t, params, *, tile_b=2048, sub=SUB):
    """t: (N, 1) float32 -> (N, 1) float32."""
    w_in, b_in, w_h, b_h, w_out, b_out = params
    N = t.shape[0]

    # --- Choose tile size -------------------------------------------------
    subs_per_tile = max(1, tile_b // sub)
    n_sub_total = -(-N // sub)            # ceil(N / sub)
    if n_sub_total >= 2:
        # Keep the grid at >= 2 steps so v7x can shard across its 2 TCs,
        # without shrinking below one sub-chunk per step.
        subs_per_tile = min(subs_per_tile, max(1, n_sub_total // 2))
    else:
        subs_per_tile = 1
    tile_b = subs_per_tile * sub

    n_tiles = -(-N // tile_b)             # ceil(N / tile_b)
    n_pad = n_tiles * tile_b

    # Batch on the lane axis; zero-pad (padding sliced off below).
    t_row = jnp.reshape(t, (1, N))
    if n_pad != N:
        t_row = jnp.pad(t_row, ((0, 0), (0, n_pad - N)))

    grid = (n_tiles,)

    # Advisory cost hint: transcendental-heavy (6 tanh per hidden feature).
    weight_bytes = 4 * (HID + HID + N_HIDDEN_LAYERS * HID * HID
                        + N_HIDDEN_LAYERS * HID + HID + 1)
    cost = pl.CostEstimate(
        flops=2 * n_pad * HID * HID * N_HIDDEN_LAYERS + 4 * n_pad * HID,
        transcendentals=6 * n_pad * HID,
        bytes_accessed=8 * n_pad + weight_bytes,
    )

    kernel = make_pinn_kernel(subs_per_tile, sub)

    out_row = pl.pallas_call(
        kernel,
        out_shape=jax.ShapeDtypeStruct((1, n_pad), jnp.float32),
        grid_spec=pltpu.PrefetchScalarGridSpec(
            num_scalar_prefetch=0,
            grid=grid,
            in_specs=[
                # Streamed input: (1, tile_b) block marching along the lanes.
                pl.BlockSpec((1, tile_b), lambda i: (0, i)),                     # t
                # Weights: constant-index full blocks -> stay VMEM-resident.
                pl.BlockSpec((HID, 1), lambda i: (0, 0)),                        # w_in
                pl.BlockSpec((HID, 1), lambda i: (0, 0)),                        # b_in
                pl.BlockSpec((N_HIDDEN_LAYERS, HID, HID), lambda i: (0, 0, 0)),  # w_h
                pl.BlockSpec((N_HIDDEN_LAYERS, HID, 1), lambda i: (0, 0, 0)),    # b_h
                pl.BlockSpec((HID, 1), lambda i: (0, 0)),                        # w_out
                pl.BlockSpec((1, 1), lambda i: (0, 0)),                          # b_out
            ],
            out_specs=pl.BlockSpec((1, tile_b), lambda i: (0, i)),
        ),
        compiler_params=pltpu.CompilerParams(
            # Parallel steps -> v7x shards them across its 2 TensorCores.
            dimension_semantics=("parallel",),
            # Guard-rail for large tiles (v7x: 64 MiB physical VMEM).
            vmem_limit_bytes=32 * 1024 * 1024,
        ),
        cost_estimate=cost,
    )(t_row, w_in, b_in, w_h, b_h, w_out, b_out)

    return jnp.reshape(out_row[:, :N], (N, 1))


def init_params(key):
    """Deterministic parameter init matching the module's shapes.

    Weights stored in PyTorch (out_features, in_features) layout; biases
    stored as (out_features, 1) columns for the feature-major kernel.
    """
    ks = jax.random.split(key, 8)

    # Linear(1, 20): PyTorch default init (uniform +/- 1/sqrt(fan_in)=1)
    w_in = jax.random.uniform(ks[0], (HID, 1), jnp.float32, -1.0, 1.0)
    b_in = jax.random.uniform(ks[1], (HID, 1), jnp.float32, -1.0, 1.0)

    # 4 x Linear(20, 20): xavier_normal weights, default-uniform biases
    xavier_std = float(np.sqrt(2.0 / (HID + HID)))
    w_h = jax.random.normal(ks[2], (N_HIDDEN_LAYERS, HID, HID), jnp.float32) * xavier_std
    bbound = float(1.0 / np.sqrt(HID))
    b_h = jax.random.uniform(ks[3], (N_HIDDEN_LAYERS, HID, 1), jnp.float32, -bbound, bbound)

    # Linear(20, 1): xavier_normal weight, default-uniform bias
    xavier_std_out = float(np.sqrt(2.0 / (HID + 1)))
    w_out = jax.random.normal(ks[4], (HID, 1), jnp.float32) * xavier_std_out
    b_out = jax.random.uniform(ks[5], (1, 1), jnp.float32, -bbound, bbound)

    return (w_in, b_in, w_h, b_h, w_out, b_out)


def pinn_reference(t, params):
    """Pure-JAX reference reproducing the PyTorch forward exactly (batch-major)."""
    w_in, b_in, w_h, b_h, w_out, b_out = params
    h = jnp.tanh(t @ w_in.T + b_in.T)      # torch.tanh(input_layer(t))
    h = jnp.tanh(h)                        # hidden_layers[0] == nn.Tanh()
    for i in range(N_HIDDEN_LAYERS):
        h = jnp.tanh(h @ w_h[i].T + b_h[i].T)
    return h @ w_out + b_out               # output layer, no activation


if __name__ == "__main__":
    key = jax.random.PRNGKey(0)
    pkey, tkey = jax.random.split(key)

    params = init_params(pkey)

    # Batch of time points, shape (N, 1), consistent with Linear(1, 20).
    # N deliberately NOT a multiple of the sub-chunk width to exercise padding,
    # and big enough to produce a >= 2-step parallel grid.
    N = 1000
    t = jax.random.uniform(tkey, (N, 1), jnp.float32, 0.0, 1.0)

    out = pinn_forward(t, params)
    out = jax.block_until_ready(out)

    ref = pinn_reference(t, params)
    np.testing.assert_allclose(np.asarray(out), np.asarray(ref), rtol=1e-5, atol=1e-5)

    print("KERNEL_OK")
</pallas_src>

<mosaic_0001>
module attributes {stable_mosaic.version = 11 : i64} {
  func.func @pinn_kernel(%arg0: i32, %arg1: memref<1x512xf32, #tpu.memory_space<vmem>>, %arg2: memref<20x1xf32, #tpu.memory_space<vmem>>, %arg3: memref<20x1xf32, #tpu.memory_space<vmem>>, %arg4: memref<4x20x20xf32, #tpu.memory_space<vmem>>, %arg5: memref<4x20x1xf32, #tpu.memory_space<vmem>>, %arg6: memref<20x1xf32, #tpu.memory_space<vmem>>, %arg7: memref<1x1xf32, #tpu.memory_space<vmem>>, %arg8: memref<1x512xf32, #tpu.memory_space<vmem>>) attributes {dimension_semantics = [#tpu.dimension_semantics<parallel>], iteration_bounds = array<i64: 2>, scalar_prefetch = 0 : i64, scratch_operands = 0 : i64, tpu.core_type = #tpu.core_type<tc>, window_params = [{transform_indices = @transform_0, window_bounds = array<i64: 1, 512>}, {pipeline_mode = #tpu.pipeline_mode<synchronous>, transform_indices = @transform_1, window_bounds = array<i64: 20, 1>}, {pipeline_mode = #tpu.pipeline_mode<synchronous>, transform_indices = @transform_2, window_bounds = array<i64: 20, 1>}, {pipeline_mode = #tpu.pipeline_mode<synchronous>, transform_indices = @transform_3, window_bounds = array<i64: 4, 20, 20>}, {pipeline_mode = #tpu.pipeline_mode<synchronous>, transform_indices = @transform_4, window_bounds = array<i64: 4, 20, 1>}, {pipeline_mode = #tpu.pipeline_mode<synchronous>, transform_indices = @transform_5, window_bounds = array<i64: 20, 1>}, {pipeline_mode = #tpu.pipeline_mode<synchronous>, transform_indices = @transform_6, window_bounds = array<i64: 1, 1>}, {transform_indices = @transform_7, window_bounds = array<i64: 1, 512>}]} {
    %c0 = arith.constant 0 : index
    %c0_0 = arith.constant 0 : index
    %0 = vector.load %arg2[%c0, %c0_0] : memref<20x1xf32, #tpu.memory_space<vmem>>, vector<20x1xf32>
    %c0_1 = arith.constant 0 : index
    %c0_2 = arith.constant 0 : index
    %1 = vector.load %arg3[%c0_1, %c0_2] : memref<20x1xf32, #tpu.memory_space<vmem>>, vector<20x1xf32>
    %c0_3 = arith.constant 0 : index
    %c0_4 = arith.constant 0 : index
    %c0_5 = arith.constant 0 : index
    %2 = vector.load %arg4[%c0_3, %c0_4, %c0_5] : memref<4x20x20xf32, #tpu.memory_space<vmem>>, vector<1x20x20xf32>
    %3 = vector.shape_cast %2 : vector<1x20x20xf32> to vector<20x20xf32>
    %c1 = arith.constant 1 : index
    %c0_6 = arith.constant 0 : index
    %c0_7 = arith.constant 0 : index
    %4 = vector.load %arg4[%c1, %c0_6, %c0_7] : memref<4x20x20xf32, #tpu.memory_space<vmem>>, vector<1x20x20xf32>
    %5 = vector.shape_cast %4 : vector<1x20x20xf32> to vector<20x20xf32>
    %c2 = arith.constant 2 : index
    %c0_8 = arith.constant 0 : index
    %c0_9 = arith.constant 0 : index
    %6 = vector.load %arg4[%c2, %c0_8, %c0_9] : memref<4x20x20xf32, #tpu.memory_space<vmem>>, vector<1x20x20xf32>
    %7 = vector.shape_cast %6 : vector<1x20x20xf32> to vector<20x20xf32>
    %c3 = arith.constant 3 : index
    %c0_10 = arith.constant 0 : index
    %c0_11 = arith.constant 0 : index
    %8 = vector.load %arg4[%c3, %c0_10, %c0_11] : memref<4x20x20xf32, #tpu.memory_space<vmem>>, vector<1x20x20xf32>
    %9 = vector.shape_cast %8 : vector<1x20x20xf32> to vector<20x20xf32>
    %c0_12 = arith.constant 0 : index
    %c0_13 = arith.constant 0 : index
    %c0_14 = arith.constant 0 : index
    %10 = vector.load %arg5[%c0_12, %c0_13, %c0_14] : memref<4x20x1xf32, #tpu.memory_space<vmem>>, vector<1x20x1xf32>
    %11 = vector.shape_cast %10 : vector<1x20x1xf32> to vector<20x1xf32>
    %c1_15 = arith.constant 1 : index
    %c0_16 = arith.constant 0 : index
    %c0_17 = arith.constant 0 : index
    %12 = vector.load %arg5[%c1_15, %c0_16, %c0_17] : memref<4x20x1xf32, #tpu.memory_space<vmem>>, vector<1x20x1xf32>
    %13 = vector.shape_cast %12 : vector<1x20x1xf32> to vector<20x1xf32>
    %c2_18 = arith.constant 2 : index
    %c0_19 = arith.constant 0 : index
    %c0_20 = arith.constant 0 : index
    %14 = vector.load %arg5[%c2_18, %c0_19, %c0_20] : memref<4x20x1xf32, #tpu.memory_space<vmem>>, vector<1x20x1xf32>
    %15 = vector.shape_cast %14 : vector<1x20x1xf32> to vector<20x1xf32>
    %c3_21 = arith.constant 3 : index
    %c0_22 = arith.constant 0 : index
    %c0_23 = arith.constant 0 : index
    %16 = vector.load %arg5[%c3_21, %c0_22, %c0_23] : memref<4x20x1xf32, #tpu.memory_space<vmem>>, vector<1x20x1xf32>
    %17 = vector.shape_cast %16 : vector<1x20x1xf32> to vector<20x1xf32>
    %c0_24 = arith.constant 0 : index
    %c0_25 = arith.constant 0 : index
    %18 = vector.load %arg6[%c0_24, %c0_25] : memref<20x1xf32, #tpu.memory_space<vmem>>, vector<20x1xf32>
    %c0_26 = arith.constant 0 : index
    %c0_27 = arith.constant 0 : index
    %19 = vector.load %arg7[%c0_26, %c0_27] : memref<1x1xf32, #tpu.memory_space<vmem>>, vector<1x1xf32>
    %c0_28 = arith.constant 0 : index
    %c0_29 = arith.constant 0 : index
    %20 = vector.load %arg1[%c0_28, %c0_29] : memref<1x512xf32, #tpu.memory_space<vmem>>, vector<1x512xf32>
    %21 = vector.broadcast %0 : vector<20x1xf32> to vector<20x512xf32>
    %22 = vector.broadcast %20 : vector<1x512xf32> to vector<20x512xf32>
    %23 = arith.mulf %21, %22 : vector<20x512xf32>
    %24 = vector.broadcast %1 : vector<20x1xf32> to vector<20x512xf32>
    %25 = arith.addf %23, %24 : vector<20x512xf32>
    %26 = math.tanh %25 : vector<20x512xf32>
    %27 = math.tanh %26 : vector<20x512xf32>
    %cst = arith.constant dense<0.000000e+00> : vector<20x512xf32>
    %28 = tpu.matmul %3, %27, %cst {dimension_numbers = #tpu.dot_dimension_numbers<[1], [0], [0], [1], [0, 0, 1, 1], [], []>} : vector<20x20xf32>, vector<20x512xf32>, vector<20x512xf32> -> vector<20x512xf32>
    %29 = vector.broadcast %11 : vector<20x1xf32> to vector<20x512xf32>
    %30 = arith.addf %28, %29 : vector<20x512xf32>
    %31 = math.tanh %30 : vector<20x512xf32>
    %cst_30 = arith.constant dense<0.000000e+00> : vector<20x512xf32>
    %32 = tpu.matmul %5, %31, %cst_30 {dimension_numbers = #tpu.dot_dimension_numbers<[1], [0], [0], [1], [0, 0, 1, 1], [], []>} : vector<20x20xf32>, vector<20x512xf32>, vector<20x512xf32> -> vector<20x512xf32>
    %33 = vector.broadcast %13 : vector<20x1xf32> to vector<20x512xf32>
    %34 = arith.addf %32, %33 : vector<20x512xf32>
    %35 = math.tanh %34 : vector<20x512xf32>
    %cst_31 = arith.constant dense<0.000000e+00> : vector<20x512xf32>
    %36 = tpu.matmul %7, %35, %cst_31 {dimension_numbers = #tpu.dot_dimension_numbers<[1], [0], [0], [1], [0, 0, 1, 1], [], []>} : vector<20x20xf32>, vector<20x512xf32>, vector<20x512xf32> -> vector<20x512xf32>
    %37 = vector.broadcast %15 : vector<20x1xf32> to vector<20x512xf32>
    %38 = arith.addf %36, %37 : vector<20x512xf32>
    %39 = math.tanh %38 : vector<20x512xf32>
    %cst_32 = arith.constant dense<0.000000e+00> : vector<20x512xf32>
    %40 = tpu.matmul %9, %39, %cst_32 {dimension_numbers = #tpu.dot_dimension_numbers<[1], [0], [0], [1], [0, 0, 1, 1], [], []>} : vector<20x20xf32>, vector<20x512xf32>, vector<20x512xf32> -> vector<20x512xf32>
    %41 = vector.broadcast %17 : vector<20x1xf32> to vector<20x512xf32>
    %42 = arith.addf %40, %41 : vector<20x512xf32>
    %43 = math.tanh %42 : vector<20x512xf32>
    %44 = vector.broadcast %18 : vector<20x1xf32> to vector<20x512xf32>
    %45 = arith.mulf %44, %43 : vector<20x512xf32>
    %cst_33 = arith.constant dense<0.000000e+00> : vector<512xf32>
    %46 = vector.multi_reduction <add>, %45, %cst_33 [0] : vector<20x512xf32> to vector<512xf32>
    %47 = vector.shape_cast %46 : vector<512xf32> to vector<1x512xf32>
    %48 = vector.broadcast %19 : vector<1x1xf32> to vector<1x512xf32>
    %49 = arith.addf %47, %48 : vector<1x512xf32>
    %c0_34 = arith.constant 0 : index
    %c0_35 = arith.constant 0 : index
    %50 = vector.load %arg8[%c0_34, %c0_35] : memref<1x512xf32, #tpu.memory_space<vmem>>, vector<1x512xf32>
    tpu.vector_store %arg8[%c0_34, %c0_35], %49 {strides = array<i32>} : memref<1x512xf32, #tpu.memory_space<vmem>>, vector<1x512xf32>,
    return
  }
  func.func @transform_0(%arg0: i32) -> (i32, i32) {
    %c0_i32 = arith.constant 0 : i32
    %c0_i32_0 = arith.constant 0 : i32
    return %c0_i32, %arg0 : i32, i32
  }
  func.func @transform_1(%arg0: i32) -> (i32, i32) {
    %c0_i32 = arith.constant 0 : i32
    %c0_i32_0 = arith.constant 0 : i32
    %c0_i32_1 = arith.constant 0 : i32
    return %c0_i32, %c0_i32_0 : i32, i32
  }
  func.func @transform_2(%arg0: i32) -> (i32, i32) {
    %c0_i32 = arith.constant 0 : i32
    %c0_i32_0 = arith.constant 0 : i32
    %c0_i32_1 = arith.constant 0 : i32
    return %c0_i32, %c0_i32_0 : i32, i32
  }
  func.func @transform_3(%arg0: i32) -> (i32, i32, i32) {
    %c0_i32 = arith.constant 0 : i32
    %c0_i32_0 = arith.constant 0 : i32
    %c0_i32_1 = arith.constant 0 : i32
    %c0_i32_2 = arith.constant 0 : i32
    return %c0_i32, %c0_i32_0, %c0_i32_1 : i32, i32, i32
  }
  func.func @transform_4(%arg0: i32) -> (i32, i32, i32) {
    %c0_i32 = arith.constant 0 : i32
    %c0_i32_0 = arith.constant 0 : i32
    %c0_i32_1 = arith.constant 0 : i32
    %c0_i32_2 = arith.constant 0 : i32
    return %c0_i32, %c0_i32_0, %c0_i32_1 : i32, i32, i32
  }
  func.func @transform_5(%arg0: i32) -> (i32, i32) {
    %c0_i32 = arith.constant 0 : i32
    %c0_i32_0 = arith.constant 0 : i32
    %c0_i32_1 = arith.constant 0 : i32
    return %c0_i32, %c0_i32_0 : i32, i32
  }
  func.func @transform_6(%arg0: i32) -> (i32, i32) {
    %c0_i32 = arith.constant 0 : i32
    %c0_i32_0 = arith.constant 0 : i32
    %c0_i32_1 = arith.constant 0 : i32
    return %c0_i32, %c0_i32_0 : i32, i32
  }
  func.func @transform_7(%arg0: i32) -> (i32, i32) {
    %c0_i32 = arith.constant 0 : i32
    %c0_i32_0 = arith.constant 0 : i32
    return %c0_i32, %arg0 : i32, i32
  }
}

</mosaic_0001>

<bundles_post_ra>
// kernel: tpu_custom_call.1
= control target key start
LH: loop header
LB: loop body
LE: loop exit
PB: predicated region body
PF: predicated region fallthrough
CT: control target
= control target key end

     0   :  { %s2138_s0 = inlined_call_operand.vmem [shape: f32[1,1024], index: 0, kind: input, shape index: {}]   ;;  %s2139_s1 = inlined_call_operand.vmem [shape: f32[20,1], index: 1, kind: input, shape index: {}]   ;;  %s2140_s2 = inlined_call_operand.vmem [shape: f32[20,1], index: 2, kind: input, shape index: {}]   ;;  %s2141_s3 = inlined_call_operand.vmem [shape: f32[4,20,20], index: 3, kind: input, shape index: {}]   ;;  %s2142_s4 = inlined_call_operand.vmem [shape: f32[4,20,1], index: 4, kind: input, shape index: {}]   ;;  %s2143_s5 = inlined_call_operand.vmem [shape: f32[20,1], index: 5, kind: input, shape index: {}]   ;;  %s2144_s6 = inlined_call_operand.<no memory space> [shape: f32[1,1], index: 6, kind: input, shape index: {}]   ;;  %s2145_s7 = inlined_call_operand.hbm [shape: f32[1,1024], index: 7, kind: output, shape index: {}]  }
   0x1   :  { %v12_v0 = vstv %s2144_s6 }
   0x2   :  { %13 = vst [vmem:[#allocation2] sm:$0x1] %v12_v0 }
   0x3   :  { %14 = vsyncpa [#allocation4], 0 }
   0x4   :  { %16 = vsyncpa [#allocation4 + $0x1], 0  ;;  %s1859_s26 = smov 0   ;;  %s1861_s27 = smov 0  }
   0x5   :  { %s1863_s28 = smov 0   ;;  %s1865_s29 = smov 0  }
   0x6 LB: > { %s1880_s6 = sadd.s32 4294967295, %s1810_s29   ;;  %s1458_s30 = sadd.s32 4294967294, %s1810_s29   ;;  %s1810_s29 = sphi %s1865_s29, %s2151_s29   ;;  %s1806_s28 = sphi %s1863_s28, %s2150_s28   ;;  %s1802_s27 = sphi %s1861_s27, %s2149_s27   ;;  %s1798_s26 = sphi %s1859_s26, %s2148_s26  }
   0x7   : > { %s1884_s8 = sadd.s32 1, %s1810_s29   ;;  %s181_s9 = sadd.s32 1, %s1806_s28 }
   0x8   : > { %s178_s10 = ssub.s32 %s1810_s29, %s1884_s8  ;;  %p191_p0 = scmp.ne.s32.totalorder %s1806_s28, %s1802_s27 }
   0x9   : > { %p179_p1 = scmp.eq.s32.totalorder %s178_s10, 0  ;;  %p192_p2 = scmp.eq.s32.totalorder %s1880_s6, 1 }
   0xa   : > { %p197_p3 = scmp.ne.s32.totalorder %s1802_s27, %s1798_s26  ;;  %p198_p4 = scmp.eq.s32.totalorder %s1458_s30, 1 }
   0xb   : > { %s1895_s11 = scalar_select %p179_p1, %s1806_s28, %s181_s9  }
   0xc   : > { %p1897_p5 = por %p192_p2, %p191_p0  ;;  %p1901_p6 = por %p198_p4, %p197_p3 }
   0xd   : > { %p1461_p7 = scmp.ge.s32.totalorder %s1810_s29, 1  ;;  %p242_p8 = scmp.lt.s32.totalorder %s1810_s29, 3 }
   0xf   : > { %p243_p9 = pnand %p1461_p7, %p242_p8 }
  0x10   : > { %v282_v1 = vld [vmem:[%s2140_s2] sm:$0xff] (!%p243_p9)  ;;  %v1812_v3 = vmov (!%p243_p9), 0   ;;  %v283_v4 = vld [vmem:[%s2140_s2 + $0x8] sm:$0xff] (!%p243_p9)  ;;  %v284_v6 = vld [vmem:[%s2140_s2 + $0x10] sm:$0xf] (!%p243_p9)  ;;  %v1813_v24 = vmov (!%p243_p9), 0.0   ;;  %v336_v25 = vlaneseq (!%p243_p9) }
  0x11   : > { %246 = sbr.rel (%p243_p9) target bundleno = 1180 (0x49c), region = 48  ;;  %v279_v2 = vld [vmem:[%s2139_s1] sm:$0xff] (!%p243_p9)  ;;  %1603 = vset.pattern.permute.xlu1 (!%p243_p9), %v1812_v3  ;;  %1602 = vset.pattern.permute.xlu0 (!%p243_p9), %v1812_v3  ;;  %v280_v5 = vld [vmem:[%s2139_s1 + $0x8] sm:$0xff] (!%p243_p9)  ;;  %v281_v7 = vld [vmem:[%s2139_s1 + $0x10] sm:$0xf] (!%p243_p9)  ;;  %s1463_s30 = sshll.u32 (!%p243_p9), %s1880_s6, 2 }
  0x12   : > { %370 = vperm.xlu1 (!%p243_p9), %1603, %v282_v1   ;;  %322 = vperm.xlu0 (!%p243_p9), %1602, %v279_v2   ;;  %v301_v8 = vld [vmem:[%s2142_s4 + $0x8] sm:$0xff] (!%p243_p9)  ;;  %v300_v9 = vld [vmem:[%s2142_s4] sm:$0xff] (!%p243_p9)  ;;  %v1473_v10 = vld [vmem:[%s2142_s4 + $0x18] sm:$0xff] (!%p243_p9)  ;;  %p274_p10 = scmp.lt.s32.totalorder (!%p243_p9), %s1463_s30, 7  ;;  %v1974_v26 = vshrl.u32 (!%p243_p9), %v336_v25, 7  ;;  %vm444_vm0 = vcmask (!%p243_p9), 1043456  }
  0x13   : > { %v302_v11 = vld [vmem:[%s2142_s4 + $0x10] sm:$0xf] (!%p243_p9)  ;;  %v1475_v12 = vld [vmem:[%s2142_s4 + $0x28] sm:$0xf] (!%p243_p9)  ;;  %v1474_v13 = vld [vmem:[%s2142_s4 + $0x20] sm:$0xff] (!%p243_p9)  ;;  %521 = vmatprep.mubr.f32.mxu0 (!%p243_p9), %v1813_v24  ;;  %604 = vmatprep.mubr.f32.mxu1 (!%p243_p9), %v1813_v24  ;;  %vm434_vm1 = vcmask (!%p243_p9), 162816  }
  0x14   : > { %v1477_v14 = vld [vmem:[%s2142_s4 + $0x38] sm:$0xff] (!%p243_p9)  ;;  %v1476_v15 = vld [vmem:[%s2142_s4 + $0x30] sm:$0xff] (!%p243_p9)  ;;  %v1479_v16 = vld [vmem:[%s2142_s4 + $0x48] sm:$0xff] (!%p243_p9)  ;;  %v338_v27 = vsub.s32 (!%p243_p9), 0, %v1974_v26  ;;  %v342_v28 = vsub.s32 (!%p243_p9), 1, %v1974_v26  ;;  %v346_v29 = vsub.s32 (!%p243_p9), 2, %v1974_v26 }
  0x15   : > { %v1478_v17 = vld [vmem:[%s2142_s4 + $0x40] sm:$0xf] (!%p243_p9)  ;;  %v1481_v18 = vld [vmem:[%s2142_s4 + $0x58] sm:$0xf] (!%p243_p9)  ;;  %v1480_v19 = vld [vmem:[%s2142_s4 + $0x50] sm:$0xff] (!%p243_p9)  ;;  %v350_v31 = vsub.s32 (!%p243_p9), 3, %v1974_v26 }
  0x16   : > { %375 = vperm.xlu1 (!%p243_p9), %1603, %v283_v4   ;;  %327 = vperm.xlu0 (!%p243_p9), %1602, %v280_v5   ;;  %v316_v20 = vld [vmem:[%s2143_s5 + $0x8] sm:$0xff] (!%p243_p9)  ;;  %v315_v21 = vld [vmem:[%s2143_s5] sm:$0xff] (!%p243_p9)  ;;  %v317_v23 = vld [vmem:[%s2143_s5 + $0x10] sm:$0xf] (!%p243_p9)  ;;  %s270_s24 = sand.u32 (!%p243_p9), 1, %s1802_s27   ;;  %vm1384_vm2 = vcmp.lt.s32.totalorder (!%p243_p9), %v336_v25, 512 }
  0x17   : > { %v318_v22 = vld [vmem:[#allocation2] sm:$0x1] (!%p243_p9)  ;;  %s1462_s25 = sshll.u32 (!%p243_p9), %s270_s24, 2  ;;  %s1388_s17 = scalar_lea.sflag (!%p243_p9), [#allocation4], %s270_s24 }
  0x18   : > { %s2153_s30 = smov (!%p274_p10, %s1463_s30), 7  ;;  %s272_s9 = scalar_lea.vmem [#allocation3], %s1462_s25 }
  0x19   : > { %s276_s14 = scalar_lea.vmem %s2138_s0, %s2153_s30  ;;  %s1527_s30 = sshll.u32 %s1880_s6, 6 }
  0x1a   : > { %380 = vperm.xlu1 %1603, %v284_v6   ;;  %332 = vperm.xlu0 %1602, %v281_v7   ;;  %v319_v30 = vld [vmem:[%s276_s14] sm:$0xf]  ;;  %s1402_s10 = sshll.u32 %s272_s9, 4  ;;  %s2096_s16 = scalar_lea.hbm %s2145_s7, %s1527_s30  ;;  %s2098_s10 = int_to_ptr.vmem [resolvable:$true] %s1402_s10 }
  0x1b   : > { %v339_v32 = vrot.slane %v319_v30, %v338_v27  ;;  %v343_v33 = vrot.slane %v319_v30, %v342_v28  ;;  %v347_v34 = vrot.slane %v319_v30, %v346_v29  ;;  %v351_v37 = vrot.slane %v319_v30, %v350_v31  ;;  %v285_v30 = vld [vmem:[%s2141_s3] sm:$0xff]  ;;  %s1748_s18 = scalar_lea.vmem %s2098_s10, 64  ;;  %s1815_s6 = smov [#allocation3]  }
  0x1c   : > { %p1749_p11 = scmp.ne.s32.totalorder %s2098_s10, %s1748_s18  ;;  %s1752_s19 = sshll.u32 %s1815_s6, 4  ;;  %s1753_s19 = int_to_ptr.vmem [resolvable:$false] %s1752_s19 }
  0x1d   : > { %s1754_s20 = scalar_lea.vmem %s1753_s19, 128  ;;  %p1755_p0 = scmp.lt.s32.totalorder %s2098_s10, %s1753_s19 }
  0x1e   : > { %426 = vperm.xlu1 %1603, %v301_v8   ;;  %421 = vperm.xlu0 %1602, %v300_v9   ;;  %p1750_p12 = pnand %p1749_p11, %p1897_p5  ;;  %p1756_p1 = scmp.lt.s32.totalorder %s1754_s20, %s1748_s18 }
  0x20   : > { %p1751_p13 = pneg %p1750_p12  ;;  %p1757_p2 = por %p1756_p1, %p1755_p0 }
  0x22   : > { %637 = vperm.xlu1 %1603, %v1473_v10   ;;  %431 = vperm.xlu0 %1602, %v302_v11   ;;  %p1758_p3 = pnand %p1757_p2, %p1751_p13 }
  0x26   : > { %647 = vperm.xlu1 %1603, %v1475_v12   ;;  %642 = vperm.xlu0 %1602, %v1474_v13  }
  0x2a   : > { %856 = vperm.xlu1 %1603, %v1477_v14   ;;  %851 = vperm.xlu0 %1602, %v1476_v15  }
  0x2e   : > { %1065 = vperm.xlu1 %1603, %v1479_v16   ;;  %861 = vperm.xlu0 %1602, %v1478_v17  }
  0x32   : > { %1075 = vperm.xlu1 %1603, %v1481_v18   ;;  %1070 = vperm.xlu0 %1602, %v1480_v19  }
  0x36   : > { %1284 = vperm.xlu1 %1603, %v316_v20   ;;  %1279 = vperm.xlu0 %1602, %v315_v21  }
  0x3a   : > { %1342 = vperm.xlu1 %1603, %v318_v22   ;;  %1289 = vperm.xlu0 %1602, %v317_v23  }
  0x91   : > { %v371_v35 = vpop.permute.xlu1 %370  ;;  %v323_v36 = vpop.permute.xlu0 %322 }
  0x92   : > { %v356_v38 = vmul.f32 %v339_v32, %v323_v36  ;;  %v357_v39 = vmul.f32 %v343_v33, %v323_v36  ;;  %v358_v40 = vmul.f32 %v347_v34, %v323_v36  ;;  %v359_v43 = vmul.f32 %v351_v37, %v323_v36  ;;  %v287_v36 = vld [vmem:[%s2141_s3 + $0x10] sm:$0xf] }
  0x94   : > { %v383_v41 = vadd.f32 %v371_v35, %v356_v38  ;;  %v384_v42 = vadd.f32 %v371_v35, %v357_v39  ;;  %v385_v44 = vadd.f32 %v371_v35, %v358_v40  ;;  %v386_v54 = vadd.f32 %v371_v35, %v359_v43 }
  0x95   : > { %v376_v45 = vpop.permute.xlu1 %375  ;;  %v328_v46 = vpop.permute.xlu0 %327 }
  0x96   : > { %1604 = vtanh.f32 %v383_v41  ;;  %v360_v47 = vmul.f32 %v339_v32, %v328_v46  ;;  %v361_v48 = vmul.f32 %v343_v33, %v328_v46  ;;  %v362_v49 = vmul.f32 %v347_v34, %v328_v46 }
  0x97   : > { %1606 = vtanh.f32 %v384_v42  ;;  %v363_v50 = vmul.f32 %v351_v37, %v328_v46 }
  0x98   : > { %v387_v51 = vadd.f32 %v376_v45, %v360_v47  ;;  %v388_v52 = vadd.f32 %v376_v45, %v361_v48  ;;  %v389_v53 = vadd.f32 %v376_v45, %v362_v49  ;;  %1608 = vtanh.f32 %v385_v44 }
  0x99   : > { %v390_v55 = vadd.f32 %v376_v45, %v363_v50  ;;  %v333_v56 = vpop.permute.xlu0 %332  ;;  %v381_v60 = vpop.permute.xlu1 %380 }
  0x9a   : > { %1610 = vtanh.f32 %v387_v51  ;;  %v364_v57 = vmul.f32 %v339_v32, %v333_v56  ;;  %v365_v58 = vmul.f32 %v343_v33, %v333_v56  ;;  %v366_v59 = vmul.f32 %v347_v34, %v333_v56  ;;  %v286_v34 = vld [vmem:[%s2141_s3 + $0x8] sm:$0xff] }
  0x9b   : > { %1612 = vtanh.f32 %v388_v52  ;;  %v367_v61 = vmul.f32 %v351_v37, %v333_v56 }
  0x9c   : > { %1614 = vtanh.f32 %v389_v53  ;;  %v391_v62 = vadd.f32 %v381_v60, %v364_v57  ;;  %v392_v63 = vadd.f32 %v381_v60, %v365_v58  ;;  %v393_v0 = vadd.f32 %v381_v60, %v366_v59 }
  0x9d   : > { %1616 = vtanh.f32 %v386_v54  ;;  %v394_v1 = vadd.f32 %v381_v60, %v367_v61  ;;  %v422_v37 = vpop.permute.xlu0 %421  ;;  %v427_v42 = vpop.permute.xlu1 %426 }
  0x9e   : > { %1618 = vtanh.f32 %v390_v55 }
  0x9f   : > { %1620 = vtanh.f32 %v392_v63 }
  0xa0   : > { %v1605_v2 = vpop.eup %1604  ;;  %1622 = vtanh.f32 %v391_v62 }
  0xa1   : > { %v1607_v3 = vpop.eup %1606  ;;  %1624 = vtanh.f32 %v393_v0  ;;  %v432_v52 = vpop.permute.xlu0 %431 }
  0xa2   : > { %1626 = vtanh.f32 %v394_v1  ;;  %v1609_v4 = vpop.eup %1608 }
  0xa3   : > { %1628 = vtanh.f32 %v1605_v2 }
  0xa4   : > { %v1611_v5 = vpop.eup %1610  ;;  %1630 = vtanh.f32 %v1607_v3 }
  0xa5   : > { %v1613_v6 = vpop.eup %1612  ;;  %1632 = vtanh.f32 %v1611_v5 }
  0xa6   : > { %v1615_v7 = vpop.eup %1614  ;;  %1634 = vtanh.f32 %v1613_v6 }
  0xa7   : > { %v1617_v8 = vpop.eup %1616  ;;  %1636 = vtanh.f32 %v1609_v4 }
  0xa8   : > { %v1619_v9 = vpop.eup %1618  ;;  %1638 = vtanh.f32 %v1615_v7 }
  0xa9   : > { %v1621_v10 = vpop.eup %1620 }
  0xaa   : > { %v1623_v11 = vpop.eup %1622  ;;  %1640 = vtanh.f32 %v1621_v10 }
  0xab   : > { %v1625_v12 = vpop.eup %1624  ;;  %1642 = vtanh.f32 %v1617_v8 }
  0xac   : > { %v1627_v13 = vpop.eup %1626  ;;  %1644 = vtanh.f32 %v1619_v9 }
  0xad   : > { %v1629_v14 = vpop.eup %1628  ;;  %1646 = vtanh.f32 %v1623_v11 }
  0xae   : > { %v1631_v15 = vpop.eup %1630  ;;  %1648 = vtanh.f32 %v1627_v13 }
  0xaf   : > { %v1633_v16 = vpop.eup %1632  ;;  %1650 = vtanh.f32 %v1625_v12  ;;  %v1464_v12 = vld [vmem:[%s2141_s3 + $0x18] sm:$0xff] }
  0xb0   : > { %v1635_v17 = vpop.eup %1634  ;;  %v1530_v18 = vpack.c.bf16 %v1633_v16, %v1629_v14  ;;  %v1465_v16 = vld [vmem:[%s2141_s3 + $0x20] sm:$0xff] }
  0xb1   : > { %v1528_v19 = vpack.c.bf16 %v1635_v17, %v1631_v15  ;;  %v1637_v20 = vpop.eup %1636 }
  0xb2   : > { %v1639_v21 = vpop.eup %1638 }
  0xb3   : > { %1529 = vmatprep.subr.bf16.mxu0 %v1528_v19  ;;  %v1534_v29 = vpack.c.bf16 %v1639_v21, %v1637_v20  ;;  %v638_v19 = vpop.permute.xlu1 %637 }
  0xb4   : > { %v1641_v22 = vpop.eup %1640  ;;  %1531 = vmatpush1.bf16.msra.mxu0 %v1530_v18  ;;  %v1466_v18 = vld [vmem:[%s2141_s3 + $0x28] sm:$0xf] }
  0xb5   : > { %v1643_v23 = vpop.eup %1642  ;;  %1482 = vmatprep.subr.msk.mxu0 %vm444_vm0, %v1641_v22 }
  0xb6   : > { %v1645_v28 = vpop.eup %1644 }
  0xb7   : > { %v1647_v31 = vpop.eup %1646  ;;  %v1532_v32 = vpack.c.bf16 %v1645_v28, %v1643_v23  ;;  %v643_v28 = vpop.permute.xlu0 %642 }
  0xb8   : > { %v1649_v33 = vpop.eup %1648  ;;  %1483 = vmatpush1.msk.msra.mxu0 %vm444_vm0, %v1647_v31 }
  0xb9   : > { %1533 = vmatprep.subr.bf16.mxu1 %v1532_v32  ;;  %1484 = vmatmul.mubr.msk.f32.vlgmr.msra.gmra.mrb[0].mxu0 %vm434_vm1, %v285_v30  ;;  %v1651_v35 = vpop.eup %1650 }
  0xba   : > { %1535 = vmatpush1.bf16.msra.mxu1 %v1534_v29  ;;  %527 = vmatprep.mubr.f32.mxu0 %v1813_v24 }
  0xbb   : > { %1487 = vmatprep.subr.msk.mxu1 %vm444_vm0, %v1649_v33 }
  0xbd   : > { %1485 = vmatmul.mubr.msk.f32.gmra.mrb[2].mxu0 %vm434_vm1, %v286_v34 }
  0xbe   : > { %1488 = vmatpush1.msk.msra.mxu1 %vm444_vm0, %v1651_v35  ;;  %533 = vmatprep.mubr.f32.mxu0 %v1813_v24 }
  0xbf   : > { %1489 = vmatmul.mubr.msk.f32.vlgmr.msra.gmra.mrb[0].mxu1 %vm434_vm1, %v285_v30 }
  0xc0   : > { %610 = vmatprep.mubr.f32.mxu1 %v1813_v24 }
  0xc1   : > { %1486 = vmatmul.mubr.msk.f32.gmra.mrb[4].mxu0 %vm434_vm1, %v287_v36 }
  0xc2   : > { %735 = vmatprep.mubr.f32.mxu0 %v1813_v24 }
  0xc3   : > { %1490 = vmatmul.mubr.msk.f32.gmra.mrb[2].mxu1 %vm434_vm1, %v286_v34 }
  0xc4   : > { %616 = vmatprep.mubr.f32.mxu1 %v1813_v24 }
  0xc7   : > { %1491 = vmatmul.mubr.msk.f32.gmra.mrb[4].mxu1 %vm434_vm1, %v287_v36 }
  0xc8   : > { %818 = vmatprep.mubr.f32.mxu1 %v1813_v24 }
 0x18c   : > { %v523_v38 = vpop.f32.mrb[0].mxu0 }
 0x18d   : > { %v524_v39 = vadd.f32 %v523_v38, %v422_v37  ;;  %v525_v40 = vpop.f32.mrb[1].mxu0  ;;  %v648_v38 = vpop.permute.xlu1 %647 }
 0x18e   : > { %v526_v41 = vadd.f32 %v525_v40, %v422_v37 }
 0x18f   : > { %1652 = vtanh.f32 %v524_v39 }
 0x190   : > { %v529_v43 = vpop.f32.mrb[2].mxu0  ;;  %1654 = vtanh.f32 %v526_v41 }
 0x191   : > { %v530_v44 = vadd.f32 %v529_v43, %v427_v42  ;;  %v531_v45 = vpop.f32.mrb[3].mxu0 }
 0x192   : > { %v606_v46 = vpop.f32.mrb[0].mxu1  ;;  %v532_v47 = vadd.f32 %v531_v45, %v427_v42 }
 0x193   : > { %v607_v48 = vadd.f32 %v606_v46, %v422_v37  ;;  %v608_v49 = vpop.f32.mrb[1].mxu1  ;;  %1656 = vtanh.f32 %v530_v44 }
 0x194   : > { %v609_v50 = vadd.f32 %v608_v49, %v422_v37  ;;  %1658 = vtanh.f32 %v532_v47  ;;  %v535_v51 = vpop.f32.mrb[4].mxu0 }
 0x195   : > { %v537_v53 = vpop.f32.mrb[5].mxu0  ;;  %1660 = vtanh.f32 %v607_v48  ;;  %v536_v58 = vadd.f32 %v535_v51, %v432_v52 }
 0x196   : > { %v612_v54 = vpop.f32.mrb[2].mxu1  ;;  %v538_v55 = vadd.f32 %v537_v53, %v432_v52  ;;  %1662 = vtanh.f32 %v609_v50 }
 0x197   : > { %v613_v56 = vadd.f32 %v612_v54, %v427_v42  ;;  %v614_v57 = vpop.f32.mrb[3].mxu1 }
 0x198   : > { %v615_v59 = vadd.f32 %v614_v57, %v427_v42  ;;  %1664 = vtanh.f32 %v538_v55 }
 0x199   : > { %1666 = vtanh.f32 %v613_v56  ;;  %v1653_v61 = vpop.eup %1652 }
 0x19a   : > { %1668 = vtanh.f32 %v615_v59  ;;  %v618_v60 = vpop.f32.mrb[4].mxu1  ;;  %v1655_v63 = vpop.eup %1654 }
 0x19b   : > { %1670 = vtanh.f32 %v536_v58  ;;  %v620_v62 = vpop.f32.mrb[5].mxu1  ;;  %v619_v2 = vadd.f32 %v618_v60, %v432_v52 }
 0x19c   : > { %v621_v0 = vadd.f32 %v620_v62, %v432_v52  ;;  %v1467_v62 = vld [vmem:[%s2141_s3 + $0x30] sm:$0xff] }
 0x19d   : > { %v1657_v1 = vpop.eup %1656 }
 0x19e   : > { %v1659_v3 = vpop.eup %1658  ;;  %1672 = vtanh.f32 %v621_v0  ;;  %v1538_v4 = vpack.c.bf16 %v1657_v1, %v1653_v61 }
 0x19f   : > { %v1536_v5 = vpack.c.bf16 %v1659_v3, %v1655_v63  ;;  %v1661_v6 = vpop.eup %1660  ;;  %1674 = vtanh.f32 %v619_v2  ;;  %v1468_v2 = vld [vmem:[%s2141_s3 + $0x38] sm:$0xff] }
 0x1a0   : > { %v1663_v7 = vpop.eup %1662 }
 0x1a1   : > { %1537 = vmatprep.subr.bf16.mxu0 %v1536_v5  ;;  %v852_v5 = vpop.permute.xlu0 %851 }
 0x1a2   : > { %v1665_v8 = vpop.eup %1664  ;;  %1539 = vmatpush1.bf16.msra.mxu0 %v1538_v4  ;;  %v1469_v4 = vld [vmem:[%s2141_s3 + $0x40] sm:$0xf] }
 0x1a3   : > { %v1667_v9 = vpop.eup %1666  ;;  %1492 = vmatprep.subr.msk.mxu0 %vm444_vm0, %v1665_v8 }
 0x1a4   : > { %v1669_v10 = vpop.eup %1668  ;;  %v1542_v11 = vpack.c.bf16 %v1667_v9, %v1661_v6 }
 0x1a5   : > { %v1671_v13 = vpop.eup %1670  ;;  %v1540_v14 = vpack.c.bf16 %v1669_v10, %v1663_v7  ;;  %v857_v10 = vpop.permute.xlu1 %856 }
 0x1a6   : > { %1493 = vmatpush1.msk.msra.mxu0 %vm444_vm0, %v1671_v13 }
 0x1a7   : > { %1541 = vmatprep.subr.bf16.mxu1 %v1540_v14  ;;  %1494 = vmatmul.mubr.msk.f32.vlgmr.msra.gmra.mrb[6].mxu0 %vm434_vm1, %v1464_v12 }
 0x1a8   : > { %v1673_v15 = vpop.eup %1672  ;;  %1543 = vmatpush1.bf16.msra.mxu1 %v1542_v11  ;;  %741 = vmatprep.mubr.f32.mxu0 %v1813_v24 }
 0x1a9   : > { %1497 = vmatprep.subr.msk.mxu1 %vm444_vm0, %v1673_v15  ;;  %v1675_v17 = vpop.eup %1674 }
 0x1ab   : > { %1495 = vmatmul.mubr.msk.f32.gmra.mrb[8].mxu0 %vm434_vm1, %v1465_v16 }
 0x1ac   : > { %1498 = vmatpush1.msk.msra.mxu1 %vm444_vm0, %v1675_v17  ;;  %747 = vmatprep.mubr.f32.mxu0 %v1813_v24 }
 0x1ad   : > { %1499 = vmatmul.mubr.msk.f32.vlgmr.msra.gmra.mrb[6].mxu1 %vm434_vm1, %v1464_v12 }
 0x1ae   : > { %824 = vmatprep.mubr.f32.mxu1 %v1813_v24 }
 0x1af   : > { %1496 = vmatmul.mubr.msk.f32.gmra.mrb[10].mxu0 %vm434_vm1, %v1466_v18 }
 0x1b0   : > { %949 = vmatprep.mubr.f32.mxu0 %v1813_v24 }
 0x1b1   : > { %1500 = vmatmul.mubr.msk.f32.gmra.mrb[8].mxu1 %vm434_vm1, %v1465_v16 }
 0x1b2   : > { %830 = vmatprep.mubr.f32.mxu1 %v1813_v24 }
 0x1b5   : > { %1501 = vmatmul.mubr.msk.f32.gmra.mrb[10].mxu1 %vm434_vm1, %v1466_v18 }
 0x1b6   : > { %1032 = vmatprep.mubr.f32.mxu1 %v1813_v24 }
 0x27a   : > { %v737_v20 = vpop.f32.mrb[6].mxu0 }
 0x27b   : > { %v738_v21 = vadd.f32 %v737_v20, %v638_v19  ;;  %v739_v22 = vpop.f32.mrb[7].mxu0  ;;  %v862_v20 = vpop.permute.xlu0 %861 }
 0x27c   : > { %v740_v23 = vadd.f32 %v739_v22, %v638_v19 }
 0x27d   : > { %1676 = vtanh.f32 %v738_v21 }
 0x27e   : > { %v743_v29 = vpop.f32.mrb[8].mxu0  ;;  %1678 = vtanh.f32 %v740_v23 }
 0x27f   : > { %v744_v30 = vadd.f32 %v743_v29, %v643_v28  ;;  %v745_v31 = vpop.f32.mrb[9].mxu0 }
 0x280   : > { %v820_v32 = vpop.f32.mrb[6].mxu1  ;;  %v746_v33 = vadd.f32 %v745_v31, %v643_v28 }
 0x281   : > { %v821_v34 = vadd.f32 %v820_v32, %v638_v19  ;;  %v822_v35 = vpop.f32.mrb[7].mxu1  ;;  %1680 = vtanh.f32 %v744_v30 }
 0x282   : > { %v823_v36 = vadd.f32 %v822_v35, %v638_v19  ;;  %1682 = vtanh.f32 %v746_v33  ;;  %v749_v37 = vpop.f32.mrb[10].mxu0 }
 0x283   : > { %v751_v39 = vpop.f32.mrb[11].mxu0  ;;  %1684 = vtanh.f32 %v821_v34  ;;  %v750_v44 = vadd.f32 %v749_v37, %v648_v38 }
 0x284   : > { %v826_v40 = vpop.f32.mrb[8].mxu1  ;;  %v752_v41 = vadd.f32 %v751_v39, %v648_v38  ;;  %1686 = vtanh.f32 %v823_v36 }
 0x285   : > { %v827_v42 = vadd.f32 %v826_v40, %v643_v28  ;;  %v828_v43 = vpop.f32.mrb[9].mxu1 }
 0x286   : > { %v829_v45 = vadd.f32 %v828_v43, %v643_v28  ;;  %1688 = vtanh.f32 %v752_v41 }
 0x287   : > { %1690 = vtanh.f32 %v827_v42  ;;  %v1677_v47 = vpop.eup %1676 }
 0x288   : > { %1692 = vtanh.f32 %v829_v45  ;;  %v832_v46 = vpop.f32.mrb[10].mxu1  ;;  %v1679_v49 = vpop.eup %1678 }
 0x289   : > { %1694 = vtanh.f32 %v750_v44  ;;  %v834_v48 = vpop.f32.mrb[11].mxu1  ;;  %v833_v52 = vadd.f32 %v832_v46, %v648_v38 }
 0x28a   : > { %v835_v50 = vadd.f32 %v834_v48, %v648_v38  ;;  %v1470_v48 = vld [vmem:[%s2141_s3 + $0x48] sm:$0xff] }
 0x28b   : > { %v1681_v51 = vpop.eup %1680 }
 0x28c   : > { %v1683_v53 = vpop.eup %1682  ;;  %1696 = vtanh.f32 %v835_v50  ;;  %v1546_v54 = vpack.c.bf16 %v1681_v51, %v1677_v47 }
 0x28d   : > { %v1544_v55 = vpack.c.bf16 %v1683_v53, %v1679_v49  ;;  %v1685_v56 = vpop.eup %1684  ;;  %1698 = vtanh.f32 %v833_v52  ;;  %v1471_v52 = vld [vmem:[%s2141_s3 + $0x50] sm:$0xff] }
 0x28e   : > { %v1687_v57 = vpop.eup %1686 }
 0x28f   : > { %1545 = vmatprep.subr.bf16.mxu0 %v1544_v55  ;;  %v1066_v55 = vpop.permute.xlu1 %1065 }
 0x290   : > { %v1689_v58 = vpop.eup %1688  ;;  %1547 = vmatpush1.bf16.msra.mxu0 %v1546_v54  ;;  %v1472_v54 = vld [vmem:[%s2141_s3 + $0x58] sm:$0xf] }
 0x291   : > { %v1691_v59 = vpop.eup %1690  ;;  %1502 = vmatprep.subr.msk.mxu0 %vm444_vm0, %v1689_v58 }
 0x292   : > { %v1693_v60 = vpop.eup %1692  ;;  %v1550_v61 = vpack.c.bf16 %v1691_v59, %v1685_v56 }
 0x293   : > { %v1695_v63 = vpop.eup %1694  ;;  %v1548_v0 = vpack.c.bf16 %v1693_v60, %v1687_v57  ;;  %v1071_v60 = vpop.permute.xlu0 %1070 }
 0x294   : > { %1503 = vmatpush1.msk.msra.mxu0 %vm444_vm0, %v1695_v63 }
 0x295   : > { %1549 = vmatprep.subr.bf16.mxu1 %v1548_v0  ;;  %1504 = vmatmul.mubr.msk.f32.vlgmr.msra.gmra.mrb[12].mxu0 %vm434_vm1, %v1467_v62 }
 0x296   : > { %v1697_v1 = vpop.eup %1696  ;;  %1551 = vmatpush1.bf16.msra.mxu1 %v1550_v61  ;;  %955 = vmatprep.mubr.f32.mxu0 %v1813_v24 }
 0x297   : > { %1507 = vmatprep.subr.msk.mxu1 %vm444_vm0, %v1697_v1  ;;  %v1699_v3 = vpop.eup %1698 }
 0x299   : > { %1505 = vmatmul.mubr.msk.f32.gmra.mrb[14].mxu0 %vm434_vm1, %v1468_v2 }
 0x29a   : > { %1508 = vmatpush1.msk.msra.mxu1 %vm444_vm0, %v1699_v3  ;;  %961 = vmatprep.mubr.f32.mxu0 %v1813_v24 }
 0x29b   : > { %1509 = vmatmul.mubr.msk.f32.vlgmr.msra.gmra.mrb[12].mxu1 %vm434_vm1, %v1467_v62 }
 0x29c   : > { %1038 = vmatprep.mubr.f32.mxu1 %v1813_v24 }
 0x29d   : > { %1506 = vmatmul.mubr.msk.f32.gmra.mrb[16].mxu0 %vm434_vm1, %v1469_v4 }
 0x29e   : > { %1163 = vmatprep.mubr.f32.mxu0 %v1813_v24 }
 0x29f   : > { %1510 = vmatmul.mubr.msk.f32.gmra.mrb[14].mxu1 %vm434_vm1, %v1468_v2 }
 0x2a0   : > { %1044 = vmatprep.mubr.f32.mxu1 %v1813_v24 }
 0x2a3   : > { %1511 = vmatmul.mubr.msk.f32.gmra.mrb[16].mxu1 %vm434_vm1, %v1469_v4  ;;  %v1076_v4 = vpop.permute.xlu1 %1075 }
 0x2a4   : > { %1246 = vmatprep.mubr.f32.mxu1 %v1813_v24 }
 0x368   : > { %v951_v6 = vpop.f32.mrb[12].mxu0 }
 0x369   : > { %v952_v7 = vadd.f32 %v951_v6, %v852_v5  ;;  %v953_v8 = vpop.f32.mrb[13].mxu0 }
 0x36a   : > { %v954_v9 = vadd.f32 %v953_v8, %v852_v5 }
 0x36b   : > { %1700 = vtanh.f32 %v952_v7 }
 0x36c   : > { %v957_v11 = vpop.f32.mrb[14].mxu0  ;;  %1702 = vtanh.f32 %v954_v9 }
 0x36d   : > { %v958_v12 = vadd.f32 %v957_v11, %v857_v10  ;;  %v959_v13 = vpop.f32.mrb[15].mxu0 }
 0x36e   : > { %v1034_v14 = vpop.f32.mrb[12].mxu1  ;;  %v960_v15 = vadd.f32 %v959_v13, %v857_v10 }
 0x36f   : > { %v1035_v16 = vadd.f32 %v1034_v14, %v852_v5  ;;  %v1036_v17 = vpop.f32.mrb[13].mxu1  ;;  %1704 = vtanh.f32 %v958_v12 }
 0x370   : > { %v1037_v18 = vadd.f32 %v1036_v17, %v852_v5  ;;  %1706 = vtanh.f32 %v960_v15  ;;  %v963_v19 = vpop.f32.mrb[16].mxu0  ;;  %v1280_v15 = vpop.permute.xlu0 %1279 }
 0x371   : > { %v965_v21 = vpop.f32.mrb[17].mxu0  ;;  %1708 = vtanh.f32 %v1035_v16  ;;  %v964_v30 = vadd.f32 %v963_v19, %v862_v20 }
 0x372   : > { %v1040_v22 = vpop.f32.mrb[14].mxu1  ;;  %v966_v23 = vadd.f32 %v965_v21, %v862_v20  ;;  %1710 = vtanh.f32 %v1037_v18  ;;  %v1285_v21 = vpop.permute.xlu1 %1284 }
 0x373   : > { %v1041_v28 = vadd.f32 %v1040_v22, %v857_v10  ;;  %v1042_v29 = vpop.f32.mrb[15].mxu1 }
 0x374   : > { %v1043_v31 = vadd.f32 %v1042_v29, %v857_v10  ;;  %1712 = vtanh.f32 %v966_v23 }
 0x375   : > { %1714 = vtanh.f32 %v1041_v28  ;;  %v1701_v33 = vpop.eup %1700 }
 0x376   : > { %1716 = vtanh.f32 %v1043_v31  ;;  %v1046_v32 = vpop.f32.mrb[16].mxu1  ;;  %v1703_v35 = vpop.eup %1702 }
 0x377   : > { %1718 = vtanh.f32 %v964_v30  ;;  %v1048_v34 = vpop.f32.mrb[17].mxu1  ;;  %v1047_v38 = vadd.f32 %v1046_v32, %v862_v20 }
 0x378   : > { %v1049_v36 = vadd.f32 %v1048_v34, %v862_v20 }
 0x379   : > { %v1705_v37 = vpop.eup %1704 }
 0x37a   : > { %v1707_v39 = vpop.eup %1706  ;;  %1720 = vtanh.f32 %v1049_v36  ;;  %v1554_v40 = vpack.c.bf16 %v1705_v37, %v1701_v33 }
 0x37b   : > { %v1552_v41 = vpack.c.bf16 %v1707_v39, %v1703_v35  ;;  %v1709_v42 = vpop.eup %1708  ;;  %1722 = vtanh.f32 %v1047_v38  ;;  %v1290_v35 = vpop.permute.xlu0 %1289 }
 0x37c   : > { %v1711_v43 = vpop.eup %1710 }
 0x37d   : > { %1553 = vmatprep.subr.bf16.mxu0 %v1552_v41 }
 0x37e   : > { %v1713_v44 = vpop.eup %1712  ;;  %1555 = vmatpush1.bf16.msra.mxu0 %v1554_v40 }
 0x37f   : > { %v1715_v45 = vpop.eup %1714  ;;  %1512 = vmatprep.subr.msk.mxu0 %vm444_vm0, %v1713_v44 }
 0x380   : > { %v1717_v46 = vpop.eup %1716  ;;  %v1558_v47 = vpack.c.bf16 %v1715_v45, %v1709_v42 }
 0x381   : > { %v1719_v49 = vpop.eup %1718  ;;  %v1556_v50 = vpack.c.bf16 %v1717_v46, %v1711_v43 }
 0x382   : > { %1513 = vmatpush1.msk.msra.mxu0 %vm444_vm0, %v1719_v49 }
 0x383   : > { %1557 = vmatprep.subr.bf16.mxu1 %v1556_v50  ;;  %1514 = vmatmul.mubr.msk.f32.vlgmr.msra.gmra.mrb[18].mxu0 %vm434_vm1, %v1470_v48 }
 0x384   : > { %v1721_v51 = vpop.eup %1720  ;;  %1559 = vmatpush1.bf16.msra.mxu1 %v1558_v47  ;;  %1169 = vmatprep.mubr.f32.mxu0 %v1813_v24 }
 0x385   : > { %1517 = vmatprep.subr.msk.mxu1 %vm444_vm0, %v1721_v51  ;;  %v1723_v53 = vpop.eup %1722 }
 0x387   : > { %1515 = vmatmul.mubr.msk.f32.gmra.mrb[20].mxu0 %vm434_vm1, %v1471_v52 }
 0x388   : > { %1518 = vmatpush1.msk.msra.mxu1 %vm444_vm0, %v1723_v53  ;;  %1175 = vmatprep.mubr.f32.mxu0 %v1813_v24 }
 0x389   : > { %1519 = vmatmul.mubr.msk.f32.vlgmr.msra.gmra.mrb[18].mxu1 %vm434_vm1, %v1470_v48 }
 0x38a   : > { %1252 = vmatprep.mubr.f32.mxu1 %v1813_v24 }
 0x38b   : > { %1516 = vmatmul.mubr.msk.f32.gmra.mrb[22].mxu0 %vm434_vm1, %v1472_v54 }
 0x38d   : > { %1520 = vmatmul.mubr.msk.f32.gmra.mrb[20].mxu1 %vm434_vm1, %v1471_v52 }
 0x38e   : > { %1258 = vmatprep.mubr.f32.mxu1 %v1813_v24 }
 0x391   : > { %1521 = vmatmul.mubr.msk.f32.gmra.mrb[22].mxu1 %vm434_vm1, %v1472_v54 }
 0x456   : > { %v1165_v56 = vpop.f32.mrb[18].mxu0 }
 0x457   : > { %v1166_v57 = vadd.f32 %v1165_v56, %v1066_v55  ;;  %v1167_v58 = vpop.f32.mrb[19].mxu0 }
 0x458   : > { %v1168_v59 = vadd.f32 %v1167_v58, %v1066_v55 }
 0x459   : > { %1724 = vtanh.f32 %v1166_v57 }
 0x45a   : > { %v1171_v61 = vpop.f32.mrb[20].mxu0  ;;  %1726 = vtanh.f32 %v1168_v59 }
 0x45b   : > { %v1172_v62 = vadd.f32 %v1171_v61, %v1071_v60  ;;  %v1173_v63 = vpop.f32.mrb[21].mxu0 }
 0x45c   : > { %v1248_v0 = vpop.f32.mrb[18].mxu1  ;;  %v1174_v1 = vadd.f32 %v1173_v63, %v1071_v60 }
 0x45d   : > { %v1249_v2 = vadd.f32 %v1248_v0, %v1066_v55  ;;  %v1250_v3 = vpop.f32.mrb[19].mxu1  ;;  %1728 = vtanh.f32 %v1172_v62 }
 0x45e   : > { %v1251_v24 = vadd.f32 %v1250_v3, %v1066_v55  ;;  %1730 = vtanh.f32 %v1174_v1  ;;  %v1177_v5 = vpop.f32.mrb[22].mxu0 }
 0x45f   : > { %1732 = vtanh.f32 %v1249_v2  ;;  %v1178_v6 = vadd.f32 %v1177_v5, %v1076_v4  ;;  %v1179_v7 = vpop.f32.mrb[23].mxu0 }
 0x460   : > { %1734 = vtanh.f32 %v1251_v24  ;;  %v1254_v8 = vpop.f32.mrb[20].mxu1  ;;  %v1180_v9 = vadd.f32 %v1179_v7, %v1076_v4 }
 0x461   : > { %v1255_v10 = vadd.f32 %v1254_v8, %v1071_v60  ;;  %v1256_v11 = vpop.f32.mrb[21].mxu1  ;;  %1736 = vtanh.f32 %v1178_v6 }
 0x462   : > { %v1257_v12 = vadd.f32 %v1256_v11, %v1071_v60  ;;  %1738 = vtanh.f32 %v1180_v9 }
 0x463   : > { %1740 = vtanh.f32 %v1255_v10  ;;  %v1725_v14 = vpop.eup %1724  ;;  %v1814_v10 = vmov 1966171168  }
 0x464   : > { %1742 = vtanh.f32 %v1257_v12  ;;  %v1260_v13 = vpop.f32.mrb[22].mxu1  ;;  %v1727_v18 = vpop.eup %1726  ;;  %v1292_v23 = vmul.f32 %v1725_v14, %v1280_v15  ;;  %v1360_v11 = vunpack.c.l.s4 %v1814_v10 }
 0x465   : > { %v1261_v16 = vadd.f32 %v1260_v13, %v1076_v4  ;;  %v1262_v17 = vpop.f32.mrb[23].mxu1  ;;  %v1293_v30 = vmul.f32 %v1727_v18, %v1280_v15 }
 0x466   : > { %v1263_v19 = vadd.f32 %v1262_v17, %v1076_v4  ;;  %v1343_v4 = vpop.permute.xlu1 %1342 }
 0x467   : > { %v1729_v20 = vpop.eup %1728  ;;  %1744 = vtanh.f32 %v1261_v16  ;;  %v1348_v12 = vrot.slane %v1343_v4, %v338_v27 }
 0x468   : > { %v1731_v22 = vpop.eup %1730  ;;  %v1296_v28 = vmul.f32 %v1729_v20, %v1285_v21  ;;  %1746 = vtanh.f32 %v1263_v19 }
 0x469   : > { %v1733_v29 = vpop.eup %1732  ;;  %v1297_v31 = vmul.f32 %v1731_v22, %v1285_v21 }
 0x46a   : > { %v1735_v32 = vpop.eup %1734  ;;  %v1304_v33 = vadd.f32 %v1296_v28, %v1292_v23  ;;  %v1294_v42 = vmul.f32 %v1733_v29, %v1280_v15 }
 0x46b   : > { %v1737_v34 = vpop.eup %1736  ;;  %v1313_v36 = vadd.f32 %v1297_v31, %v1293_v30  ;;  %v1295_v45 = vmul.f32 %v1735_v32, %v1280_v15 }
 0x46c   : > { %v1739_v37 = vpop.eup %1738  ;;  %v1300_v38 = vmul.f32 %v1737_v34, %v1290_v35 }
 0x46d   : > { %v1741_v39 = vpop.eup %1740  ;;  %v1301_v40 = vmul.f32 %v1739_v37, %v1290_v35 }
 0x46e   : > { %v1743_v41 = vpop.eup %1742  ;;  %v1298_v43 = vmul.f32 %v1741_v39, %v1285_v21  ;;  %v1305_v44 = vsel %vm444_vm0, %v1300_v38, 0.0 }
 0x46f   : > { %v1299_v46 = vmul.f32 %v1743_v41, %v1285_v21  ;;  %v1306_v47 = vadd.f32 %v1305_v44, %v1304_v33  ;;  %v1314_v48 = vsel %vm444_vm0, %v1301_v40, 0.0  ;;  %v1361_v21 = vunpack.c.0.s8 %v1360_v11 }
 0x470   : > { %v1322_v49 = vadd.f32 %v1298_v43, %v1294_v42  ;;  %v1315_v50 = vadd.f32 %v1314_v48, %v1313_v36 }
 0x471   : > { %v1745_v51 = vpop.eup %1744  ;;  %v1331_v52 = vadd.f32 %v1299_v46, %v1295_v45  ;;  %v1307_v53 = vrot.slane %v1306_v47, 4  ;;  %v1364_v31 = vsub.s32 %v1361_v21, %v1974_v26 }
 0x472   : > { %v1747_v54 = vpop.eup %1746  ;;  %v1302_v55 = vmul.f32 %v1745_v51, %v1290_v35  ;;  %v1316_v56 = vrot.slane %v1315_v50, 4 }
 0x473   : > { %v1308_v57 = vadd.f32 %v1307_v53, %v1306_v47  ;;  %v1303_v58 = vmul.f32 %v1747_v54, %v1290_v35 }
 0x474   : > { %v1323_v59 = vsel %vm444_vm0, %v1302_v55, 0.0  ;;  %v1317_v60 = vadd.f32 %v1316_v56, %v1315_v50 }
 0x475   : > { %v1309_v61 = vrot.slane %v1308_v57, 2  ;;  %v1324_v62 = vadd.f32 %v1323_v59, %v1322_v49  ;;  %v1332_v63 = vsel %vm444_vm0, %v1303_v58, 0.0 }
 0x476   : > { %v1318_v0 = vrot.slane %v1317_v60, 2  ;;  %v1333_v1 = vadd.f32 %v1332_v63, %v1331_v52 }
 0x477   : > { %v1310_v2 = vadd.f32 %v1309_v61, %v1308_v57  ;;  %v1325_v3 = vrot.slane %v1324_v62, 4 }
 0x478   : > { %v1319_v24 = vadd.f32 %v1318_v0, %v1317_v60  ;;  %v1334_v5 = vrot.slane %v1333_v1, 4 }
 0x479   : > { %v1326_v6 = vadd.f32 %v1325_v3, %v1324_v62  ;;  %v1311_v7 = vrot.slane %v1310_v2, 1 }
 0x47a   : > { %v1335_v8 = vadd.f32 %v1334_v5, %v1333_v1  ;;  %v1320_v9 = vrot.slane %v1319_v24, 1 }
 0x47b   : > { %v1327_v13 = vrot.slane %v1326_v6, 2  ;;  %v1312_v14 = vadd.f32 %v1311_v7, %v1310_v2 }
 0x47c   : > { %v1336_v15 = vrot.slane %v1335_v8, 2  ;;  %v1321_v16 = vadd.f32 %v1320_v9, %v1319_v24 }
 0x47d   : > { %v1328_v17 = vadd.f32 %v1327_v13, %v1326_v6  ;;  %v1349_v18 = vadd.f32 %v1348_v12, %v1312_v14 }
 0x47e   : > { %v1337_v19 = vadd.f32 %v1336_v15, %v1335_v8  ;;  %v1350_v20 = vadd.f32 %v1348_v12, %v1321_v16 }
 0x47f   : > { %v1329_v22 = vrot.slane %v1328_v17, 1 }
 0x480   : > { %v1338_v23 = vrot.slane %v1337_v19, 1  ;;  %v1357_v28 = vcombine.low %v1349_v18, %v1350_v20 }
 0x481   : > { %v1330_v29 = vadd.f32 %v1329_v22, %v1328_v17 }
 0x482   : > { %v1339_v30 = vadd.f32 %v1338_v23, %v1337_v19  ;;  %v1365_v34 = vrot.slane %v1357_v28, %v1364_v31 }
 0x483   : > { %v1351_v27 = vadd.f32 %v1348_v12, %v1330_v29 }
 0x484   : > { %v1352_v32 = vadd.f32 %v1348_v12, %v1339_v30 }
 0x486   : > { %v1358_v33 = vcombine.low %v1351_v27, %v1352_v32 }
 0x488   : > { %v1372_v35 = vrot.slane %v1358_v33, %v1364_v31 }
 0x48a   : > { %v1373_v36 = vcombine.low %v1365_v34, %v1372_v35 }
 0x48c   : > { %v1380_v37 = vrot.slane %v1373_v36, %v1364_v31 }
 0x48e   : > { %1386 = vst.msk [vmem:[%s272_s9] sm:$0xf] %vm1384_vm2, %v1380_v37 }
 0x48f   : > { %1761 = shalt.err (!%p1758_p3)
}
 0x490   : > { %s1762_s21 = scalar_lea.hbm %s2096_s16, 64  ;;  %s1766_s24 = scalar_lea.hbm %s2145_s7, 128 }
 0x491   : > { %p1763_p4 = scmp.ne.s32.totalorder %s2096_s16, %s1762_s21  ;;  %p1767_p9 = scmp.lt.u32.totalorder %s2096_s16, %s2145_s7 }
 0x492   : > { %p1768_p10 = scmp.lt.u32.totalorder %s1766_s24, %s1762_s21  ;;  %p1770_p12 = scmp.lt.u32.totalorder %s1762_s21, %s2096_s16 }
 0x493   : > { %p1764_p7 = pnand %p1763_p4, %p1897_p5 }
 0x494   : > { %p1769_p11 = por %p1768_p10, %p1767_p9 }
 0x495   : > { %p1765_p8 = pneg %p1764_p7 }
 0x496   : > { %p1771_p13 = por %p1770_p12, %p1769_p11 }
 0x498   : > { %p1772_p0 = pnand %p1771_p13, %p1765_p8 }
 0x49a   : > { %1775 = shalt.err (!%p1772_p0)
}
 0x49b   : > { %1560 = dma.vmem_to_hbm [thread:$0]  (%p1897_p5), %s2098_s10, 64, %s2096_s16, %s1388_s17  }
 0x49c PF: > { %p1566_p1 = scmp.ge.s32.totalorder %s1810_s29, 2  ;;  %s1414_s9 = sand.u32 1, %s1798_s26  }
 0x49d   : > { %s1415_s14 = scalar_lea.sflag [#allocation4], %s1414_s9 }
 0x49e   : > { %p1563_p2 = pnand %p1566_p1, %p1901_p6 }
 0x4a0   : > { %1793 = dma.done.wait (!%p1563_p2), %s1415_s14, 64  }
 0x4a1   : > { %1795 = vsyncadd (!%p1563_p2), %s1415_s14, 4294967232  ;;  %p19_p3 = scmp.ge.s32.totalorder %s1884_s8, 4   ;;  %s2148_s26 = smov %s1802_s27 }
 0x4a2   : > { %s2149_s27 = smov %s1806_s28  ;;  %s2150_s28 = smov %s1895_s11 }
 0x4a3   : > { %s2151_s29 = smov %s1884_s8  ;;  %21 = sbr.rel (!%p19_p3) target bundleno = 6 (0x6), region = 89 }
 0x4aa   :  { %1420 = vsyncpa [#allocation4], 1 }
 0x4ab   :  { %1422 = vsyncpa [#allocation4 + $0x1], 1 }

</bundles_post_ra>
